<compile_context>
chip_gen: v5e
topology: v5e:2x2
jax: 0.10.0
libtpu: 0.0.40
codegen_flags: <defaults>
</compile_context>

<pallas_src>
import jax
import jax.numpy as jnp
import numpy as np
from jax.experimental import pallas as pl
from jax.experimental.pallas import tpu as pltpu  # noqa: F401  (TPU backend)

_LANES = 128  # lane width of a vreg; last dim must be a multiple of this


def _policy_forward_kernel(x_ref, o_ref):
    # Identity / no-op body: the reference forward() performs no computation.
    o_ref[...] = x_ref[...]


def _policy_forward_impl(x):
    """Pallas-backed stand-in for PolicyModel.forward().

    The PyTorch forward() returns None and does no work; here we run a single
    full-block, sublane+lane dense, aliased identity kernel over the
    observation tensor.  Note: this intentionally returns the observation
    tensor (the PyTorch stub returns None).
    """
    B, C, H, W = x.shape
    n = B * C * H * W                      # 2*4*16*16 = 2048
    rows = n // _LANES                     # 2048 / 128 = 16 -> (16, 128)

    # Sublane- and lane-dense slab: (16, 128) fills two whole (8,128) f32
    # vregs, so every vld/vst is unmasked full-width.  Inside jit this
    # reshape is a free bitcast, not a dispatched op.
    x2 = x.reshape(rows, _LANES)

    out = pl.pallas_call(
        _policy_forward_kernel,
        out_shape=jax.ShapeDtypeStruct((rows, _LANES), x.dtype),
        # No grid: one invocation, one full-array block resident in VMEM.
        in_specs=[pl.BlockSpec((rows, _LANES), lambda: (0, 0))],
        out_specs=pl.BlockSpec((rows, _LANES), lambda: (0, 0)),
        # P8: identity output aliases the input buffer — under jit + donation
        # this removes the HBM writeback half of the traffic.
        input_output_aliases={0: 0},
    )(x2)

    return out.reshape(B, C, H, W)


# jit + donation so the alias and the reshapes are actually free.
policy_model_forward = jax.jit(_policy_forward_impl, donate_argnums=0)


if __name__ == "__main__":
    key = jax.random.PRNGKey(0)
    # Small NCHW observation batch consistent with an image-policy model.
    B, C, H, W = 2, 4, 16, 16
    x = jax.random.normal(key, (B, C, H, W), dtype=jnp.float32)

    # x is donated to the jitted call below; keep a host copy for the check.
    x_host = np.asarray(jax.device_get(x))

    y = policy_model_forward(x)
    jax.block_until_ready(y)

    # The reference forward() performs no computation; the kernel must be a
    # pure pass-through of its input.
    assert y.shape == (B, C, H, W) and y.dtype == jnp.float32
    assert np.array_equal(np.asarray(jax.device_get(y)), x_host)

    print("KERNEL_OK")
</pallas_src>

<mosaic_0001>
module attributes {stable_mosaic.version = 11 : i64} {
  func.func @_policy_forward_kernel(%arg0: memref<16x128xf32, #tpu.memory_space<vmem>>, %arg1: memref<16x128xf32, #tpu.memory_space<vmem>>) attributes {dimension_semantics = [], scalar_prefetch = 0 : i64, scratch_operands = 0 : i64, tpu.core_type = #tpu.core_type<tc>} {
    %c0 = arith.constant 0 : index
    %c0_0 = arith.constant 0 : index
    %0 = vector.load %arg0[%c0, %c0_0] : memref<16x128xf32, #tpu.memory_space<vmem>>, vector<16x128xf32>
    %c0_1 = arith.constant 0 : index
    %c0_2 = arith.constant 0 : index
    %1 = vector.load %arg1[%c0_1, %c0_2] : memref<16x128xf32, #tpu.memory_space<vmem>>, vector<16x128xf32>
    tpu.vector_store %arg1[%c0_1, %c0_2], %0 {strides = array<i32>} : memref<16x128xf32, #tpu.memory_space<vmem>>, vector<16x128xf32>,
    return
  }
}

</mosaic_0001>

<bundles_post_ra>
// kernel: _policy_forward_impl.1
= control target key start
LH: loop header
LB: loop body
LE: loop exit
PB: predicated region body
PF: predicated region fallthrough
CT: control target
= control target key end

     0   :  { %s38_s0 = inlined_call_operand.vmem [shape: f32[16,128], index: 0, kind: input, shape index: {}, may-alias: {0,1}]   ;;  %s39_s1 = inlined_call_operand.vmem [shape: f32[16,128], index: 1, kind: output, shape index: {}, may-alias: {0,1}]  }
   0x1   :  { %v8_v0 = vld [vmem:[%s38_s0] sm:$0xff]  ;;  %v9_v1 = vld [vmem:[%s38_s0 + $0x8] sm:$0xff] }
   0x2   :  { %10 = vst [vmem:[%s39_s1] sm:$0xff] %v8_v0 }
   0x3   :  { %11 = vst [vmem:[%s39_s1 + $0x8] sm:$0xff] %v9_v1 }

</bundles_post_ra>
